<compile_context>
chip_gen: v7x
topology: tpu7x:2x2x1
jax: 0.10.0
libtpu: 0.0.40
codegen_flags: <defaults>
</compile_context>

<pallas_src>
import functools

import jax
import jax.numpy as jnp
from jax.experimental import pallas as pl
from jax.experimental.pallas import tpu as pltpu


def _cdiv(a, b):
    return (a + b - 1) // b


def _round_up(a, b):
    return _cdiv(a, b) * b


def _chip_config():
    """Per-generation tuning knobs (robust string match on device_kind)."""
    kind = ""
    try:
        kind = jax.devices()[0].device_kind.lower()
    except Exception:  # pragma: no cover - CPU/interpret fallback
        pass
    if "v7" in kind or "7x" in kind:
        # 2 TensorCores per chip: want >=4 (ideally even) grid steps so both TCs
        # get >=2 blocks under dimension_semantics=("parallel",). 64 MiB VMEM/TC.
        return dict(min_steps=4, target_block_bytes=2 << 20, min_pallas_bytes=1 << 20)
    if "v6" in kind:
        # Single TC, 128 MiB VMEM, 32 MiB scoped default -> 4 MiB blocks are free.
        return dict(min_steps=2, target_block_bytes=4 << 20, min_pallas_bytes=512 << 10)
    # v5e / unknown: single TC, 16 MiB scoped-VMEM default -> keep blocks at 2 MiB.
    return dict(min_steps=2, target_block_bytes=2 << 20, min_pallas_bytes=256 << 10)


def _softplus_offset_kernel(x_ref, o_ref, *, beta, inv_beta, threshold):
    xf = x_ref[...].astype(jnp.float32)
    bx = beta * xf
    # PyTorch Softplus: linear above threshold, (1/beta)*log1p(exp(beta*x)) otherwise.
    # minimum() keeps the non-selected branch from overflowing exp (matches PyTorch
    # behavior for the default threshold range).
    sp = jnp.where(
        bx > threshold,
        xf,
        inv_beta * jnp.log1p(jnp.exp(jnp.minimum(bx, threshold))),
    )
    o_ref[...] = (sp + (1.0 + 1e-6)).astype(o_ref.dtype)


def _softplus_offset_jnp(x, beta, threshold):
    xf = x.astype(jnp.float32)
    bx = beta * xf
    sp = jnp.where(
        bx > threshold,
        xf,
        (1.0 / beta) * jnp.log1p(jnp.exp(jnp.minimum(bx, threshold))),
    )
    return (sp + (1.0 + 1e-6)).astype(x.dtype)


def _widest_lane_divisor(n):
    for cand in (1024, 512, 256, 128):
        if n % cand == 0:
            return cand
    return None


def softplus_with_offset(x, beta: float = 1.0, threshold: float = 20.0, *,
                         target_block_bytes: int = None,
                         min_pallas_bytes: int = None,
                         force_pallas: bool = False):
    """Elementwise SoftplusWithOffset. Works for any input shape / float dtype."""
    beta = float(beta)
    threshold = float(threshold)
    orig_shape = x.shape
    dtype = x.dtype
    n = x.size
    if n == 0:
        return x

    cfg = _chip_config()
    if target_block_bytes is None:
        target_block_bytes = cfg["target_block_bytes"]
    if min_pallas_bytes is None:
        min_pallas_bytes = cfg["min_pallas_bytes"]
    min_steps = cfg["min_steps"]

    itemsize = jnp.dtype(dtype).itemsize
    if (n * itemsize < min_pallas_bytes) and not force_pallas:
        # Tiny tensors: launch + pipeline-warmup overhead dominates on fast-HBM
        # chips; plain fused XLA elementwise is faster and needs no plumbing.
        return _softplus_offset_jnp(x, beta, threshold)

    x_flat = jnp.reshape(x, (-1,))

    # Widest lane dim that divides n -> lane-dense, unmasked stores. If n is not a
    # multiple of 128, run the kernel on the 128-aligned prefix and handle the
    # (<128-element) tail in jnp -- NO full-array pad/concat round trips.
    lanes = _widest_lane_divisor(n)
    if lanes is None:
        n_main = (n // 128) * 128
        if n_main == 0:
            return _softplus_offset_jnp(x, beta, threshold)
        lanes = _widest_lane_divisor(n_main)
        x_main = x_flat[:n_main]
        tail = x_flat[n_main:]
    else:
        n_main = n
        x_main = x_flat
        tail = None

    rows = n_main // lanes
    x2d = jnp.reshape(x_main, (rows, lanes))

    # ---- Block sizing -------------------------------------------------------
    # Blocks as close to target_block_bytes as possible (mem-bound sweet spot),
    # with only min_steps grid steps for DMA/compute overlap (2 on single-TC
    # chips, 4 on dual-TC v7x). Sublane granularity is dtype-aware.
    sub = {4: 8, 2: 16, 1: 32}.get(itemsize, 8)
    tr_target = max(sub, (target_block_bytes // (lanes * itemsize)) // sub * sub)

    if rows <= tr_target:
        if rows >= min_steps * sub:
            # Split into ~min_steps blocks for pipeline overlap / both v7x TCs.
            tr = _round_up(_cdiv(rows, min_steps), sub)
        else:
            tr = rows  # single block == full array dim (legal even if not a mult. of sub)
    else:
        tr = tr_target
        if _cdiv(rows, tr) < min_steps:
            tr = max(sub, (rows // min_steps) // sub * sub)
    grid = (_cdiv(rows, tr),)  # partial last block handled by Pallas masking

    blk_bytes = tr * lanes * itemsize
    # Footprint: 2 arrays x 2 buffers x block. Stay <= 32 MiB scoped VMEM, which is
    # safe on every generation (v7x has 64 MiB/TC; v5e physical VMEM is 128 MiB).
    vmem_limit = int(min(32 << 20, max(16 << 20, 4 * blk_bytes + (2 << 20))))

    kernel = functools.partial(
        _softplus_offset_kernel,
        beta=beta, inv_beta=1.0 / beta, threshold=threshold)

    y2d = pl.pallas_call(
        kernel,
        out_shape=jax.ShapeDtypeStruct((rows, lanes), dtype),
        grid_spec=pltpu.PrefetchScalarGridSpec(
            num_scalar_prefetch=0,
            grid=grid,
            in_specs=[pl.BlockSpec((tr, lanes), lambda i: (i, 0))],
            out_specs=pl.BlockSpec((tr, lanes), lambda i: (i, 0)),
        ),
        compiler_params=pltpu.CompilerParams(
            dimension_semantics=("parallel",),
            vmem_limit_bytes=vmem_limit),
        cost_estimate=pl.CostEstimate(
            flops=5 * n_main,
            transcendentals=2 * n_main,
            bytes_accessed=2 * n_main * itemsize),
    )(x2d)

    y_flat = jnp.reshape(y2d, (-1,))
    if tail is not None:
        y_flat = jnp.concatenate(
            [y_flat, _softplus_offset_jnp(tail, beta, threshold)], axis=0)
    return jnp.reshape(y_flat, orig_shape)


def _reference(x, beta=1.0, threshold=20.0):
    return _softplus_offset_jnp(x, float(beta), float(threshold))


if __name__ == "__main__":
    key = jax.random.PRNGKey(0)
    k1, k2, k3 = jax.random.split(key, 3)

    # Small input consistent with the (shape-agnostic) module: batch=2, channels=4, 16x16.
    x = jax.random.normal(k1, (2, 4, 16, 16), dtype=jnp.float32) * 10.0

    # 1) Pallas path (forced so the kernel definitely runs on this small input).
    y = softplus_with_offset(x, beta=1.0, threshold=20.0, force_pallas=True)
    y = jax.block_until_ready(y)
    y_ref = _reference(x, 1.0, 20.0)
    assert y.shape == x.shape and y.dtype == x.dtype
    assert jnp.allclose(y, y_ref, atol=1e-5, rtol=1e-5), "pallas path mismatch"

    # 2) Default dispatch (tiny input -> fused XLA path), same semantics.
    y_fast = jax.block_until_ready(softplus_with_offset(x))
    assert jnp.allclose(y_fast, y_ref, atol=1e-5, rtol=1e-5), "fast path mismatch"

    # 3) Non-multiple-of-128 element count, non-default params: aligned prefix goes
    #    through the kernel, the <128-element tail through jnp (no pad copy).
    x2 = jax.random.normal(k2, (3, 500), dtype=jnp.float32) * 5.0
    y2 = jax.block_until_ready(
        softplus_with_offset(x2, beta=2.0, threshold=15.0, force_pallas=True))
    y2_ref = _reference(x2, 2.0, 15.0)
    assert y2.shape == x2.shape
    assert jnp.allclose(y2, y2_ref, atol=1e-5, rtol=1e-5), "tail path mismatch"

    # 4) bf16 I/O stays bf16 (halves HBM traffic); upcast happens inside kernel.
    x3 = (jax.random.normal(k3, (8, 640), dtype=jnp.float32) * 10.0).astype(jnp.bfloat16)
    y3 = jax.block_until_ready(softplus_with_offset(x3, force_pallas=True))
    y3_ref = _reference(x3)
    assert y3.dtype == jnp.bfloat16
    assert jnp.allclose(y3.astype(jnp.float32), y3_ref.astype(jnp.float32),
                        atol=1e-2, rtol=1e-2), "bf16 path mismatch"

    print("KERNEL_OK")
</pallas_src>

<mosaic_0001>
module attributes {stable_mosaic.version = 11 : i64} {
  func.func @_softplus_offset_kernel(%arg0: i32, %arg1: memref<2x1024xf32, #tpu.memory_space<vmem>>, %arg2: memref<2x1024xf32, #tpu.memory_space<vmem>>) attributes {dimension_semantics = [#tpu.dimension_semantics<parallel>], iteration_bounds = array<i64: 1>, scalar_prefetch = 0 : i64, scratch_operands = 0 : i64, tpu.core_type = #tpu.core_type<tc>, window_params = [{transform_indices = @transform_0, window_bounds = array<i64: 2, 1024>}, {transform_indices = @transform_1, window_bounds = array<i64: 2, 1024>}]} {
    %c0 = arith.constant 0 : index
    %c0_0 = arith.constant 0 : index
    %0 = vector.load %arg1[%c0, %c0_0] : memref<2x1024xf32, #tpu.memory_space<vmem>>, vector<2x1024xf32>
    %cst = arith.constant 1.000000e+00 : f32
    %1 = vector.broadcast %cst : f32 to vector<2x1024xf32>
    %2 = arith.mulf %1, %0 : vector<2x1024xf32>
    %cst_1 = arith.constant 2.000000e+01 : f32
    %3 = vector.broadcast %cst_1 : f32 to vector<2x1024xf32>
    %4 = arith.cmpf ogt, %2, %3 : vector<2x1024xf32>
    %cst_2 = arith.constant 2.000000e+01 : f32
    %5 = vector.broadcast %cst_2 : f32 to vector<2x1024xf32>
    %6 = arith.minimumf %2, %5 : vector<2x1024xf32>
    %7 = math.exp %6 : vector<2x1024xf32>
    %8 = math.log1p %7 : vector<2x1024xf32>
    %cst_3 = arith.constant 1.000000e+00 : f32
    %9 = vector.broadcast %cst_3 : f32 to vector<2x1024xf32>
    %10 = arith.mulf %9, %8 : vector<2x1024xf32>
    %11 = arith.select %4, %0, %10 : vector<2x1024xi1>, vector<2x1024xf32>
    %cst_4 = arith.constant 1.00000095 : f32
    %12 = vector.broadcast %cst_4 : f32 to vector<2x1024xf32>
    %13 = arith.addf %11, %12 : vector<2x1024xf32>
    %c0_5 = arith.constant 0 : index
    %c0_6 = arith.constant 0 : index
    %14 = vector.load %arg2[%c0_5, %c0_6] : memref<2x1024xf32, #tpu.memory_space<vmem>>, vector<2x1024xf32>
    tpu.vector_store %arg2[%c0_5, %c0_6], %13 {strides = array<i32>} : memref<2x1024xf32, #tpu.memory_space<vmem>>, vector<2x1024xf32>,
    return
  }
  func.func @transform_0(%arg0: i32) -> (i32, i32) {
    %c0_i32 = arith.constant 0 : i32
    %c0_i32_0 = arith.constant 0 : i32
    return %arg0, %c0_i32 : i32, i32
  }
  func.func @transform_1(%arg0: i32) -> (i32, i32) {
    %c0_i32 = arith.constant 0 : i32
    %c0_i32_0 = arith.constant 0 : i32
    return %arg0, %c0_i32 : i32, i32
  }
}

</mosaic_0001>

<bundles_post_ra>
// kernel: tpu_custom_call.1
= control target key start
LH: loop header
LB: loop body
LE: loop exit
PB: predicated region body
PF: predicated region fallthrough
CT: control target
= control target key end

     0   :  { %6 = vsyncpa [#allocation3], 0  ;;  %s164_s0 = inlined_call_operand.hbm [shape: f32[2,1024], index: 0, kind: input, shape index: {}]   ;;  %s165_s1 = inlined_call_operand.hbm [shape: f32[2,1024], index: 1, kind: output, shape index: {}]  }
   0x1   :  { %7 = vsyncpa [#allocation4], 0  ;;  %s128_s6 = smov [#allocation2]   ;;  %s80_s10 = scalar_lea.hbm %s164_s0, 256 }
   0x2   :  { %s14_s7 = sshll.u32 %s128_s6, 4  ;;  %p81_p0 = scmp.ne.s32.totalorder %s164_s0, %s80_s10  ;;  %s15_s7 = int_to_ptr.vmem [resolvable:$true] %s14_s7 }
   0x3   :  { %p84_p1 = scmp.lt.u32.totalorder %s80_s10, %s164_s0 }
   0x5   :  { %p86_p2 = pnand %p84_p1, %p81_p0 }
   0x7   :  { %89 = shalt.err (!%p86_p2)
}
   0x8   :  { %s90_s15 = scalar_lea.vmem %s15_s7, 256  ;;  %p95_p4 = scmp.lt.s32.totalorder %s15_s7, %s15_s7 }
   0x9   :  { %p91_p3 = scmp.ne.s32.totalorder %s15_s7, %s90_s15  ;;  %p96_p5 = scmp.lt.s32.totalorder %s90_s15, %s90_s15 }
   0xb   :  { %p97_p6 = por %p96_p5, %p95_p4 }
   0xd   :  { %p98_p7 = pnand %p97_p6, %p91_p3 }
   0xf   :  { %101 = shalt.err (!%p98_p7)
}
  0x10   :  { %17 = dma.hbm_to_vmem [thread:$0]  %s164_s0, 256, %s15_s7, [#allocation3]  }
  0x11   :  { %124 = dma.done.wait [#allocation3], 256  }
  0x12   :  { %125 = vsyncadd [#allocation3], 4294967040  ;;  %v21_v0 = vld [vmem:[#allocation2] sm:$0xff]  ;;  %v22_v1 = vld [vmem:[#allocation2 + $0x8] sm:$0xff]  ;;  %s129_s0 = smov [#allocation5]  }
  0x13   :  { %v25_v2 = vmin.f32 %v21_v0, 20.0  ;;  %v26_v3 = vmin.f32 %v22_v1, 20.0  ;;  %vm23_vm1 = vcmp.gt.f32.partialorder %v21_v0, 20.0  ;;  %vm24_vm3 = vcmp.gt.f32.partialorder %v22_v1, 20.0  ;;  %s61_s18 = sshll.u32 %s129_s0, 4  ;;  %s62_s18 = int_to_ptr.vmem [resolvable:$true] %s61_s18 }
  0x14   :  { %s102_s19 = scalar_lea.vmem %s62_s18, 256  ;;  %p107_p9 = scmp.lt.s32.totalorder %s62_s18, %s62_s18 }
  0x15   :  { %v27_v4 = vmul.f32 1.442695, %v25_v2  ;;  %v29_v5 = vmul.f32 1.442695, %v26_v3  ;;  %p103_p8 = scmp.ne.s32.totalorder %s62_s18, %s102_s19  ;;  %p108_p10 = scmp.lt.s32.totalorder %s102_s19, %s102_s19 }
  0x17   :  { %72 = vpow2.f32 %v27_v4  ;;  %p109_p11 = por %p108_p10, %p107_p9 }
  0x18   :  { %74 = vpow2.f32 %v29_v5 }
  0x19   :  { %p110_p12 = pnand %p109_p11, %p103_p8 }
  0x21   :  { %v73_v6 = vpop.eup %72 }
  0x22   :  { %v75_v7 = vpop.eup %74  ;;  %v31_v8 = vadd.f32 1.0, %v73_v6  ;;  %v34_v10 = vmul.f32 -0.5, %v73_v6  ;;  %v37_v13 = vand.u32 2147483647, %v73_v6 }
  0x23   :  { %v40_v9 = vadd.f32 1.0, %v75_v7  ;;  %v43_v11 = vmul.f32 -0.5, %v75_v7  ;;  %v46_v15 = vand.u32 2147483647, %v75_v7 }
  0x24   :  { %76 = vlog2.f32 %v31_v8  ;;  %v35_v12 = vadd.f32 1.0, %v34_v10  ;;  %vm38_vm0 = vcmp.lt.f32.partialorder %v37_v13, 0.0004427343 }
  0x25   :  { %78 = vlog2.f32 %v40_v9  ;;  %v44_v14 = vadd.f32 1.0, %v43_v11  ;;  %vm47_vm2 = vcmp.lt.f32.partialorder %v46_v15, 0.0004427343 }
  0x26   :  { %v36_v16 = vmul.f32 %v73_v6, %v35_v12 }
  0x27   :  { %v45_v18 = vmul.f32 %v75_v7, %v44_v14 }
  0x2e   :  { %v77_v17 = vpop.eup %76 }
  0x2f   :  { %v79_v19 = vpop.eup %78  ;;  %v33_v20 = vmul.f32 0.6931472, %v77_v17 }
  0x30   :  { %v42_v21 = vmul.f32 0.6931472, %v79_v19 }
  0x31   :  { %v39_v22 = vsel %vm38_vm0, %v36_v16, %v33_v20 }
  0x32   :  { %v49_v23 = vsel %vm23_vm1, %v21_v0, %v39_v22  ;;  %v48_v24 = vsel %vm47_vm2, %v45_v18, %v42_v21 }
  0x33   :  { %v51_v25 = vadd.f32 1.000001, %v49_v23  ;;  %v50_v26 = vsel %vm24_vm3, %v22_v1, %v48_v24 }
  0x34   :  { %v52_v27 = vadd.f32 1.000001, %v50_v26 }
  0x35   :  { %53 = vst [vmem:[#allocation5] sm:$0xff] %v51_v25 }
  0x36   :  { %54 = vst [vmem:[#allocation5 + $0x8] sm:$0xff] %v52_v27 }
  0x37   :  { %113 = shalt.err (!%p110_p12)
}
  0x38   :  { %s114_s22 = scalar_lea.hbm %s165_s1, 256 }
  0x39   :  { %p115_p13 = scmp.ne.s32.totalorder %s165_s1, %s114_s22  ;;  %p118_p0 = scmp.lt.u32.totalorder %s114_s22, %s165_s1 }
  0x3b   :  { %p120_p1 = pnand %p118_p0, %p115_p13 }
  0x3d   :  { %123 = shalt.err (!%p120_p1)
}
  0x3e   :  { %64 = dma.vmem_to_hbm [thread:$0]  %s62_s18, 256, %s165_s1, [#allocation4]  }
  0x3f   :  { %126 = dma.done.wait [#allocation4], 256  }
  0x40   :  { %127 = vsyncadd [#allocation4], 4294967040 }
  0x41   :  { %68 = vsyncpa [#allocation3], 1 }
  0x42   :  { %69 = vsyncpa [#allocation4], 1 }

</bundles_post_ra>
